<compile_context>
chip_gen: v7x
topology: tpu7x:2x2x1
jax: 0.10.0
libtpu: 0.0.40
codegen_flags: <defaults>
</compile_context>

<pallas_src>
import functools

import jax
import jax.numpy as jnp
from jax import lax
from jax.experimental import pallas as pl
from jax.experimental.pallas import tpu as pltpu


def _l2_normalize(x, eps=1e-12):
    # matches torch.nn.functional.normalize(p=2, dim=1, eps=1e-12):
    #   x / max(||x||, eps)  ==  x * rsqrt(max(||x||^2, eps^2))
    sumsq = jnp.sum(x * x, axis=1, keepdims=True)
    return x * lax.rsqrt(jnp.maximum(sumsq, eps * eps))


def _intro_alignment_kernel(texts_ref, imgs_row_ref, imgs_col_ref,
                            inst_row_ref, inst_col_ref, labels_ref,
                            out_ref, denom_acc,
                            *, inv_temperature, relu_const):
    i = pl.program_id(0)
    j = pl.program_id(1)
    nj = pl.num_programs(1)

    # global (1, 2) accumulator [sum(log_ratio * mask), sum(mask)]; its output
    # BlockSpec index_map is constant, so it stays resident in VMEM across the
    # whole grid -- zero it once at the very first grid point.
    @pl.when(jnp.logical_and(i == 0, j == 0))
    def _():
        out_ref[...] = jnp.zeros_like(out_ref)

    # per-row-block denominator accumulator, reset at the start of each row block
    @pl.when(j == 0)
    def _():
        denom_acc[...] = jnp.zeros_like(denom_acc)

    texts = _l2_normalize(texts_ref[...].astype(jnp.float32))        # (tm, D)
    inst_r = _l2_normalize(inst_row_ref[...].astype(jnp.float32))    # (tm, D)
    imgs_c = _l2_normalize(imgs_col_ref[...].astype(jnp.float32))    # (tn, D)
    inst_c = _l2_normalize(inst_col_ref[...].astype(jnp.float32))    # (tn, D)

    contract = (((1,), (1,)), ((), ()))  # A @ B.T without materializing B.T
    s = lax.dot_general(texts, imgs_c, contract,
                        preferred_element_type=jnp.float32)          # (tm, tn)
    e = jnp.exp(s * inv_temperature)
    g = lax.dot_general(inst_r, inst_c, contract,
                        preferred_element_type=jnp.float32)          # (tm, tn)
    # relu(threshold - (g + 1) / 2) == 0.5 * relu((2*threshold - 1) - g)
    w = 0.5 * jnp.maximum(relu_const - g, 0.0)
    denom_acc[...] += jnp.sum(e * w, axis=1, keepdims=True)

    @pl.when(j == nj - 1)
    def _():
        imgs_r = _l2_normalize(imgs_row_ref[...].astype(jnp.float32))  # (tm, D)
        # diagonal of exp(texts @ imgs.T / T), computed as a row-wise dot
        log_nom = (jnp.sum(texts * imgs_r, axis=1, keepdims=True)
                   * inv_temperature)                                  # (tm, 1)
        nom = jnp.exp(log_nom)
        denom = denom_acc[...] + nom
        mask = 1.0 - labels_ref[...].astype(jnp.float32)               # (tm, 1)
        loss_part = jnp.sum((log_nom - jnp.log(denom)) * mask)
        mask_part = jnp.sum(mask)
        lane = lax.broadcasted_iota(jnp.int32, (1, 2), 1)
        out_ref[...] += jnp.where(lane == 0, loss_part, mask_part)


def _pick_block(n, max_block=512):
    """Largest row/col tile that evenly divides n (multiple of 8 when tiling)."""
    if n <= max_block:
        return n
    start = max_block - (max_block % 8)
    for b in range(start, 0, -8):
        if n % b == 0:
            return b
    return n  # fallback: whole axis in one block


def intro_alignment_loss(train_texts, train_imgs, labels, instances,
                         temperature=1.0, threshold=0.0,
                         block_m=None, block_n=None):
    """Pallas wrapper for the theta=False forward pass.

    Returns (loss, mask.sum()) exactly as the PyTorch module does.
    NOTE: like the PyTorch reference, loss is NaN/Inf if all labels are 1
    (mask.sum() == 0); callers must ensure at least one negative label.
    """
    n, d = train_texts.shape
    labels2d = labels.reshape(n, 1).astype(jnp.float32)

    tm = _pick_block(n) if block_m is None else block_m
    tn = _pick_block(n) if block_n is None else block_n
    assert n % tm == 0 and n % tn == 0, (n, tm, tn)

    kern = functools.partial(
        _intro_alignment_kernel,
        inv_temperature=1.0 / float(temperature),
        relu_const=2.0 * float(threshold) - 1.0,
    )

    partials = pl.pallas_call(
        kern,
        out_shape=jax.ShapeDtypeStruct((1, 2), jnp.float32),
        grid_spec=pltpu.PrefetchScalarGridSpec(
            num_scalar_prefetch=0,
            grid=(n // tm, n // tn),
            in_specs=[
                pl.BlockSpec((tm, d), lambda i, j: (i, 0)),   # texts   (rows)
                pl.BlockSpec((tm, d), lambda i, j: (i, 0)),   # imgs    (rows, nominator)
                pl.BlockSpec((tn, d), lambda i, j: (j, 0)),   # imgs    (cols)
                pl.BlockSpec((tm, d), lambda i, j: (i, 0)),   # inst    (rows)
                pl.BlockSpec((tn, d), lambda i, j: (j, 0)),   # inst    (cols)
                pl.BlockSpec((tm, 1), lambda i, j: (i, 0)),   # labels  (rows)
            ],
            out_specs=pl.BlockSpec((1, 2), lambda i, j: (0, 0)),
            scratch_shapes=[pltpu.VMEM((tm, 1), jnp.float32)],
        ),
        compiler_params=pltpu.CompilerParams(
            dimension_semantics=("arbitrary", "arbitrary")),
    )(train_texts, train_imgs, train_imgs, instances, instances, labels2d)

    loss_sum = partials[0, 0]
    mask_sum = partials[0, 1]
    loss = -loss_sum / mask_sum
    return loss, mask_sum


def _reference(train_texts, train_imgs, labels, instances, temperature, threshold):
    # pure-JAX reference mirroring the PyTorch forward (theta=False)
    def normalize(x, eps=1e-12):
        norm = jnp.sqrt(jnp.sum(x * x, axis=1, keepdims=True))
        return x / jnp.maximum(norm, eps)

    inst = normalize(instances.astype(jnp.float32))
    i2i = (inst @ inst.T + 1.0) / 2.0
    i2i = jnp.maximum(threshold - i2i, 0.0)
    texts = normalize(train_texts.astype(jnp.float32))
    imgs = normalize(train_imgs.astype(jnp.float32))
    t2i = jnp.exp(texts @ imgs.T / temperature)
    nom = jnp.diagonal(t2i)
    denom = jnp.sum(t2i * i2i, axis=1) + nom
    mask = 1.0 - labels.astype(jnp.float32)
    loss = -jnp.sum(jnp.log(nom / denom) * mask) / jnp.sum(mask)
    return loss, jnp.sum(mask)


if __name__ == "__main__":
    key = jax.random.PRNGKey(0)

    # --- test 1: tiny shapes, single grid point -----------------------------
    k1, k2, k3 = jax.random.split(key, 3)
    N, D = 8, 32
    train_texts = jax.random.normal(k1, (N, D), dtype=jnp.float32)
    train_imgs = jax.random.normal(k2, (N, D), dtype=jnp.float32)
    instances = jax.random.normal(k3, (N, D), dtype=jnp.float32)
    labels = jnp.array([0., 1., 0., 0., 1., 0., 1., 0.], dtype=jnp.float32)
    temperature, threshold = 0.5, 0.8

    loss, msum = intro_alignment_loss(train_texts, train_imgs, labels, instances,
                                      temperature=temperature, threshold=threshold)
    jax.block_until_ready((loss, msum))
    ref_loss, ref_msum = _reference(train_texts, train_imgs, labels, instances,
                                    temperature, threshold)
    assert jnp.allclose(loss, ref_loss, rtol=1e-4, atol=1e-4), (loss, ref_loss)
    assert jnp.allclose(msum, ref_msum), (msum, ref_msum)

    # --- test 2: larger shapes exercising the 2-D blocked grid ---------------
    k4, k5, k6, k7 = jax.random.split(jax.random.PRNGKey(1), 4)
    N2, D2 = 64, 128
    texts2 = jax.random.normal(k4, (N2, D2), dtype=jnp.float32)
    imgs2 = jax.random.normal(k5, (N2, D2), dtype=jnp.float32)
    inst2 = jax.random.normal(k6, (N2, D2), dtype=jnp.float32)
    labels2 = (jax.random.uniform(k7, (N2,)) < 0.5).astype(jnp.float32)
    labels2 = labels2.at[0].set(0.0)  # guarantee mask.sum() > 0

    loss2, msum2 = intro_alignment_loss(texts2, imgs2, labels2, inst2,
                                        temperature=1.0, threshold=0.6,
                                        block_m=16, block_n=32)  # grid (4, 2)
    jax.block_until_ready((loss2, msum2))
    ref_loss2, ref_msum2 = _reference(texts2, imgs2, labels2, inst2, 1.0, 0.6)
    assert jnp.allclose(loss2, ref_loss2, rtol=1e-4, atol=1e-4), (loss2, ref_loss2)
    assert jnp.allclose(msum2, ref_msum2), (msum2, ref_msum2)

    print("KERNEL_OK")
</pallas_src>

<mosaic_0001>
module attributes {stable_mosaic.version = 11 : i64} {
  func.func @_intro_alignment_kernel(%arg0: i32, %arg1: i32, %arg2: memref<8x32xf32, #tpu.memory_space<vmem>>, %arg3: memref<8x32xf32, #tpu.memory_space<vmem>>, %arg4: memref<8x32xf32, #tpu.memory_space<vmem>>, %arg5: memref<8x32xf32, #tpu.memory_space<vmem>>, %arg6: memref<8x32xf32, #tpu.memory_space<vmem>>, %arg7: memref<8x1xf32, #tpu.memory_space<vmem>>, %arg8: memref<1x2xf32, #tpu.memory_space<vmem>>, %arg9: memref<8x1xf32, #tpu.memory_space<vmem>>) attributes {dimension_semantics = [#tpu.dimension_semantics<arbitrary>, #tpu.dimension_semantics<arbitrary>], iteration_bounds = array<i64: 1, 1>, scalar_prefetch = 0 : i64, scratch_operands = 1 : i64, tpu.core_type = #tpu.core_type<tc>, window_params = [{transform_indices = @transform_0, window_bounds = array<i64: 8, 32>}, {transform_indices = @transform_1, window_bounds = array<i64: 8, 32>}, {transform_indices = @transform_2, window_bounds = array<i64: 8, 32>}, {transform_indices = @transform_3, window_bounds = array<i64: 8, 32>}, {transform_indices = @transform_4, window_bounds = array<i64: 8, 32>}, {transform_indices = @transform_5, window_bounds = array<i64: 8, 1>}, {pipeline_mode = #tpu.pipeline_mode<synchronous>, transform_indices = @transform_6, window_bounds = array<i64: 1, 2>}]} {
    %c0_i32 = arith.constant 0 : i32
    %0 = arith.cmpi eq, %arg0, %c0_i32 : i32
    %c0_i32_0 = arith.constant 0 : i32
    %1 = arith.cmpi eq, %arg1, %c0_i32_0 : i32
    %2 = arith.andi %0, %1 : i1
    %3 = arith.extui %2 : i1 to i32
    %c0_i32_1 = arith.constant 0 : i32
    %4 = arith.cmpi ne, %3, %c0_i32_1 : i32
    scf.if %4 {
      %cst_31 = arith.constant 0.000000e+00 : f32
      %64 = vector.broadcast %cst_31 : f32 to vector<1x2xf32>
      %c0_32 = arith.constant 0 : index
      %c0_33 = arith.constant 0 : index
      %65 = vector.load %arg8[%c0_32, %c0_33] : memref<1x2xf32, #tpu.memory_space<vmem>>, vector<1x2xf32>
      tpu.vector_store %arg8[%c0_32, %c0_33], %64 {strides = array<i32>} : memref<1x2xf32, #tpu.memory_space<vmem>>, vector<1x2xf32>,
    } else {
    }
    %c0_i32_2 = arith.constant 0 : i32
    %5 = arith.cmpi eq, %arg1, %c0_i32_2 : i32
    %6 = arith.extui %5 : i1 to i32
    %c0_i32_3 = arith.constant 0 : i32
    %7 = arith.cmpi ne, %6, %c0_i32_3 : i32
    scf.if %7 {
      %cst_31 = arith.constant 0.000000e+00 : f32
      %64 = vector.broadcast %cst_31 : f32 to vector<8x1xf32>
      %c0_32 = arith.constant 0 : index
      %c0_33 = arith.constant 0 : index
      %65 = vector.load %arg9[%c0_32, %c0_33] : memref<8x1xf32, #tpu.memory_space<vmem>>, vector<8x1xf32>
      tpu.vector_store %arg9[%c0_32, %c0_33], %64 {strides = array<i32>} : memref<8x1xf32, #tpu.memory_space<vmem>>, vector<8x1xf32>,
    } else {
    }
    %c0 = arith.constant 0 : index
    %c0_4 = arith.constant 0 : index
    %8 = vector.load %arg2[%c0, %c0_4] : memref<8x32xf32, #tpu.memory_space<vmem>>, vector<8x32xf32>
    %9 = arith.mulf %8, %8 : vector<8x32xf32>
    %cst = arith.constant dense<0.000000e+00> : vector<8xf32>
    %10 = vector.multi_reduction <add>, %9, %cst [1] : vector<8x32xf32> to vector<8xf32>
    %11 = vector.shape_cast %10 : vector<8xf32> to vector<8x1xf32>
    %cst_5 = arith.constant 1.000000e-24 : f32
    %12 = vector.broadcast %cst_5 : f32 to vector<8x1xf32>
    %13 = arith.maximumf %11, %12 : vector<8x1xf32>
    %14 = math.rsqrt %13 : vector<8x1xf32>
    %15 = vector.broadcast %14 : vector<8x1xf32> to vector<8x32xf32>
    %16 = arith.mulf %8, %15 : vector<8x32xf32>
    %c0_6 = arith.constant 0 : index
    %c0_7 = arith.constant 0 : index
    %17 = vector.load %arg5[%c0_6, %c0_7] : memref<8x32xf32, #tpu.memory_space<vmem>>, vector<8x32xf32>
    %18 = arith.mulf %17, %17 : vector<8x32xf32>
    %cst_8 = arith.constant dense<0.000000e+00> : vector<8xf32>
    %19 = vector.multi_reduction <add>, %18, %cst_8 [1] : vector<8x32xf32> to vector<8xf32>
    %20 = vector.shape_cast %19 : vector<8xf32> to vector<8x1xf32>
    %cst_9 = arith.constant 1.000000e-24 : f32
    %21 = vector.broadcast %cst_9 : f32 to vector<8x1xf32>
    %22 = arith.maximumf %20, %21 : vector<8x1xf32>
    %23 = math.rsqrt %22 : vector<8x1xf32>
    %24 = vector.broadcast %23 : vector<8x1xf32> to vector<8x32xf32>
    %25 = arith.mulf %17, %24 : vector<8x32xf32>
    %c0_10 = arith.constant 0 : index
    %c0_11 = arith.constant 0 : index
    %26 = vector.load %arg4[%c0_10, %c0_11] : memref<8x32xf32, #tpu.memory_space<vmem>>, vector<8x32xf32>
    %27 = arith.mulf %26, %26 : vector<8x32xf32>
    %cst_12 = arith.constant dense<0.000000e+00> : vector<8xf32>
    %28 = vector.multi_reduction <add>, %27, %cst_12 [1] : vector<8x32xf32> to vector<8xf32>
    %29 = vector.shape_cast %28 : vector<8xf32> to vector<8x1xf32>
    %cst_13 = arith.constant 1.000000e-24 : f32
    %30 = vector.broadcast %cst_13 : f32 to vector<8x1xf32>
    %31 = arith.maximumf %29, %30 : vector<8x1xf32>
    %32 = math.rsqrt %31 : vector<8x1xf32>
    %33 = vector.broadcast %32 : vector<8x1xf32> to vector<8x32xf32>
    %34 = arith.mulf %26, %33 : vector<8x32xf32>
    %c0_14 = arith.constant 0 : index
    %c0_15 = arith.constant 0 : index
    %35 = vector.load %arg6[%c0_14, %c0_15] : memref<8x32xf32, #tpu.memory_space<vmem>>, vector<8x32xf32>
    %36 = arith.mulf %35, %35 : vector<8x32xf32>
    %cst_16 = arith.constant dense<0.000000e+00> : vector<8xf32>
    %37 = vector.multi_reduction <add>, %36, %cst_16 [1] : vector<8x32xf32> to vector<8xf32>
    %38 = vector.shape_cast %37 : vector<8xf32> to vector<8x1xf32>
    %cst_17 = arith.constant 1.000000e-24 : f32
    %39 = vector.broadcast %cst_17 : f32 to vector<8x1xf32>
    %40 = arith.maximumf %38, %39 : vector<8x1xf32>
    %41 = math.rsqrt %40 : vector<8x1xf32>
    %42 = vector.broadcast %41 : vector<8x1xf32> to vector<8x32xf32>
    %43 = arith.mulf %35, %42 : vector<8x32xf32>
    %cst_18 = arith.constant dense<0.000000e+00> : vector<8x8xf32>
    %44 = tpu.matmul %16, %34, %cst_18 {dimension_numbers = #tpu.dot_dimension_numbers<[1], [1], [0], [0], [0, 0, 1, 0], [], []>} : vector<8x32xf32>, vector<8x32xf32>, vector<8x8xf32> -> vector<8x8xf32>
    %cst_19 = arith.constant 2.000000e+00 : f32
    %45 = vector.broadcast %cst_19 : f32 to vector<8x8xf32>
    %46 = arith.mulf %44, %45 : vector<8x8xf32>
    %47 = math.exp %46 : vector<8x8xf32>
    %cst_20 = arith.constant dense<0.000000e+00> : vector<8x8xf32>
    %48 = tpu.matmul %25, %43, %cst_20 {dimension_numbers = #tpu.dot_dimension_numbers<[1], [1], [0], [0], [0, 0, 1, 0], [], []>} : vector<8x32xf32>, vector<8x32xf32>, vector<8x8xf32> -> vector<8x8xf32>
    %cst_21 = arith.constant 6.000000e-01 : f32
    %49 = vector.broadcast %cst_21 : f32 to vector<8x8xf32>
    %50 = arith.subf %49, %48 : vector<8x8xf32>
    %cst_22 = arith.constant 0.000000e+00 : f32
    %51 = vector.broadcast %cst_22 : f32 to vector<8x8xf32>
    %52 = arith.maximumf %50, %51 : vector<8x8xf32>
    %cst_23 = arith.constant 5.000000e-01 : f32
    %53 = vector.broadcast %cst_23 : f32 to vector<8x8xf32>
    %54 = arith.mulf %53, %52 : vector<8x8xf32>
    %c0_24 = arith.constant 0 : index
    %c0_25 = arith.constant 0 : index
    %55 = vector.load %arg9[%c0_24, %c0_25] : memref<8x1xf32, #tpu.memory_space<vmem>>, vector<8x1xf32>
    %56 = arith.mulf %47, %54 : vector<8x8xf32>
    %cst_26 = arith.constant dense<0.000000e+00> : vector<8xf32>
    %57 = vector.multi_reduction <add>, %56, %cst_26 [1] : vector<8x8xf32> to vector<8xf32>
    %58 = vector.shape_cast %57 : vector<8xf32> to vector<8x1xf32>
    %59 = arith.addf %55, %58 : vector<8x1xf32>
    %c0_27 = arith.constant 0 : index
    %c0_28 = arith.constant 0 : index
    %60 = vector.load %arg9[%c0_27, %c0_28] : memref<8x1xf32, #tpu.memory_space<vmem>>, vector<8x1xf32>
    tpu.vector_store %arg9[%c0_27, %c0_28], %59 {strides = array<i32>} : memref<8x1xf32, #tpu.memory_space<vmem>>, vector<8x1xf32>,
    %c0_i32_29 = arith.constant 0 : i32
    %61 = arith.cmpi eq, %arg1, %c0_i32_29 : i32
    %62 = arith.extui %61 : i1 to i32
    %c0_i32_30 = arith.constant 0 : i32
    %63 = arith.cmpi ne, %62, %c0_i32_30 : i32
    scf.if %63 {
      %c0_31 = arith.constant 0 : index
      %c0_32 = arith.constant 0 : index
      %64 = vector.load %arg3[%c0_31, %c0_32] : memref<8x32xf32, #tpu.memory_space<vmem>>, vector<8x32xf32>
      %65 = arith.mulf %64, %64 : vector<8x32xf32>
      %cst_33 = arith.constant dense<0.000000e+00> : vector<8xf32>
      %66 = vector.multi_reduction <add>, %65, %cst_33 [1] : vector<8x32xf32> to vector<8xf32>
      %67 = vector.shape_cast %66 : vector<8xf32> to vector<8x1xf32>
      %cst_34 = arith.constant 1.000000e-24 : f32
      %68 = vector.broadcast %cst_34 : f32 to vector<8x1xf32>
      %69 = arith.maximumf %67, %68 : vector<8x1xf32>
      %70 = math.rsqrt %69 : vector<8x1xf32>
      %71 = vector.broadcast %70 : vector<8x1xf32> to vector<8x32xf32>
      %72 = arith.mulf %64, %71 : vector<8x32xf32>
      %73 = arith.mulf %16, %72 : vector<8x32xf32>
      %cst_35 = arith.constant dense<0.000000e+00> : vector<8xf32>
      %74 = vector.multi_reduction <add>, %73, %cst_35 [1] : vector<8x32xf32> to vector<8xf32>
      %75 = vector.shape_cast %74 : vector<8xf32> to vector<8x1xf32>
      %cst_36 = arith.constant 2.000000e+00 : f32
      %76 = vector.broadcast %cst_36 : f32 to vector<8x1xf32>
      %77 = arith.mulf %75, %76 : vector<8x1xf32>
      %78 = math.exp %77 : vector<8x1xf32>
      %c0_37 = arith.constant 0 : index
      %c0_38 = arith.constant 0 : index
      %79 = vector.load %arg9[%c0_37, %c0_38] : memref<8x1xf32, #tpu.memory_space<vmem>>, vector<8x1xf32>
      %80 = arith.addf %79, %78 : vector<8x1xf32>
      %c0_39 = arith.constant 0 : index
      %c0_40 = arith.constant 0 : index
      %81 = vector.load %arg7[%c0_39, %c0_40] : memref<8x1xf32, #tpu.memory_space<vmem>>, vector<8x1xf32>
      %cst_41 = arith.constant 1.000000e+00 : f32
      %82 = vector.broadcast %cst_41 : f32 to vector<8x1xf32>
      %83 = arith.subf %82, %81 : vector<8x1xf32>
      %84 = math.log %80 : vector<8x1xf32>
      %85 = arith.subf %77, %84 : vector<8x1xf32>
      %86 = arith.mulf %85, %83 : vector<8x1xf32>
      %87 = vector.shape_cast %86 : vector<8x1xf32> to vector<1x8x1xf32>
      %cst_42 = arith.constant dense<0.000000e+00> : vector<1xf32>
      %88 = vector.multi_reduction <add>, %87, %cst_42 [1, 2] : vector<1x8x1xf32> to vector<1xf32>
      %89 = vector.shape_cast %88 : vector<1xf32> to vector<1x1x1xf32>
      %90 = vector.extract %89[0, 0, 0] : f32 from vector<1x1x1xf32>
      %91 = vector.shape_cast %83 : vector<8x1xf32> to vector<1x8x1xf32>
      %cst_43 = arith.constant dense<0.000000e+00> : vector<1xf32>
      %92 = vector.multi_reduction <add>, %91, %cst_43 [1, 2] : vector<1x8x1xf32> to vector<1xf32>
      %93 = vector.shape_cast %92 : vector<1xf32> to vector<1x1x1xf32>
      %94 = vector.extract %93[0, 0, 0] : f32 from vector<1x1x1xf32>
      %95 = tpu.iota {dimensions = array<i32: 1>} : vector<1x2xi32>
      %c0_44 = arith.constant 0 : index
      %c0_45 = arith.constant 0 : index
      %96 = vector.load %arg8[%c0_44, %c0_45] : memref<1x2xf32, #tpu.memory_space<vmem>>, vector<1x2xf32>
      %c0_i32_46 = arith.constant 0 : i32
      %97 = vector.broadcast %c0_i32_46 : i32 to vector<1x2xi32>
      %98 = arith.cmpi eq, %95, %97 : vector<1x2xi32>
      %99 = vector.broadcast %90 : f32 to vector<1x2xf32>
      %100 = vector.broadcast %94 : f32 to vector<1x2xf32>
      %101 = arith.select %98, %99, %100 : vector<1x2xi1>, vector<1x2xf32>
      %102 = arith.addf %96, %101 : vector<1x2xf32>
      %c0_47 = arith.constant 0 : index
      %c0_48 = arith.constant 0 : index
      %103 = vector.load %arg8[%c0_47, %c0_48] : memref<1x2xf32, #tpu.memory_space<vmem>>, vector<1x2xf32>
      tpu.vector_store %arg8[%c0_47, %c0_48], %102 {strides = array<i32>} : memref<1x2xf32, #tpu.memory_space<vmem>>, vector<1x2xf32>,
    } else {
    }
    return
  }
  func.func @transform_0(%arg0: i32, %arg1: i32) -> (i32, i32) {
    %c0_i32 = arith.constant 0 : i32
    %c0_i32_0 = arith.constant 0 : i32
    return %arg0, %c0_i32 : i32, i32
  }
  func.func @transform_1(%arg0: i32, %arg1: i32) -> (i32, i32) {
    %c0_i32 = arith.constant 0 : i32
    %c0_i32_0 = arith.constant 0 : i32
    return %arg0, %c0_i32 : i32, i32
  }
  func.func @transform_2(%arg0: i32, %arg1: i32) -> (i32, i32) {
    %c0_i32 = arith.constant 0 : i32
    %c0_i32_0 = arith.constant 0 : i32
    return %arg1, %c0_i32 : i32, i32
  }
  func.func @transform_3(%arg0: i32, %arg1: i32) -> (i32, i32) {
    %c0_i32 = arith.constant 0 : i32
    %c0_i32_0 = arith.constant 0 : i32
    return %arg0, %c0_i32 : i32, i32
  }
  func.func @transform_4(%arg0: i32, %arg1: i32) -> (i32, i32) {
    %c0_i32 = arith.constant 0 : i32
    %c0_i32_0 = arith.constant 0 : i32
    return %arg1, %c0_i32 : i32, i32
  }
  func.func @transform_5(%arg0: i32, %arg1: i32) -> (i32, i32) {
    %c0_i32 = arith.constant 0 : i32
    %c0_i32_0 = arith.constant 0 : i32
    return %arg0, %c0_i32 : i32, i32
  }
  func.func @transform_6(%arg0: i32, %arg1: i32) -> (i32, i32) {
    %c0_i32 = arith.constant 0 : i32
    %c0_i32_0 = arith.constant 0 : i32
    %c0_i32_1 = arith.constant 0 : i32
    return %c0_i32, %c0_i32_0 : i32, i32
  }
}

</mosaic_0001>

<bundles_post_ra>
// kernel: tpu_custom_call.1
= control target key start
LH: loop header
LB: loop body
LE: loop exit
PB: predicated region body
PF: predicated region fallthrough
CT: control target
= control target key end

     0   :  { %11 = vsyncpa [#allocation4], 0  ;;  %s558_s0 = inlined_call_operand.vmem [shape: f32[8,32], index: 0, kind: input, shape index: {}]   ;;  %s559_s1 = inlined_call_operand.hbm [shape: f32[8,32], index: 1, kind: input, shape index: {}]   ;;  %s560_s2 = inlined_call_operand.vmem [shape: f32[8,32], index: 2, kind: input, shape index: {}]   ;;  %s561_s3 = inlined_call_operand.hbm [shape: f32[8,32], index: 3, kind: input, shape index: {}]   ;;  %s562_s4 = inlined_call_operand.vmem [shape: f32[8,32], index: 4, kind: input, shape index: {}]   ;;  %s563_s5 = inlined_call_operand.vmem [shape: f32[8,1], index: 5, kind: input, shape index: {}]   ;;  %s564_s6 = inlined_call_operand.hbm [shape: f32[1,2], index: 6, kind: output, shape index: {}]  }
   0x1   :  { %12 = vsyncpa [#allocation7], 0 }
   0x2   :  { %13 = vsyncpa [#allocation5], 0  ;;  %s448_s21 = smov [#allocation3]   ;;  %s449_s23 = smov [#allocation6]  }
   0x3   :  { %s22_s22 = sshll.u32 %s448_s21, 4  ;;  %s34_s24 = sshll.u32 %s449_s23, 4  ;;  %s23_s22 = int_to_ptr.vmem [resolvable:$true] %s22_s22  ;;  %s35_s24 = int_to_ptr.vmem [resolvable:$true] %s34_s24 }
   0x4   :  { %s376_s27 = scalar_lea.hbm %s559_s1, 128 }
   0x5   :  { %p377_p0 = scmp.ne.s32.totalorder %s559_s1, %s376_s27  ;;  %p380_p1 = scmp.lt.u32.totalorder %s376_s27, %s559_s1 }
   0x7   :  { %p382_p2 = pnand %p380_p1, %p377_p0 }
   0x9   :  { %385 = shalt.err (!%p382_p2)
}
   0xa   :  { %s386_s8 = scalar_lea.vmem %s23_s22, 128  ;;  %p391_p4 = scmp.lt.s32.totalorder %s23_s22, %s23_s22 }
   0xb   :  { %p387_p3 = scmp.ne.s32.totalorder %s23_s22, %s386_s8  ;;  %p392_p5 = scmp.lt.s32.totalorder %s386_s8, %s386_s8 }
   0xd   :  { %p393_p6 = por %p392_p5, %p391_p4 }
   0xf   :  { %p394_p7 = pnand %p393_p6, %p387_p3 }
  0x11   :  { %397 = shalt.err (!%p394_p7)
}
  0x12   :  { %25 = dma.hbm_to_vmem [thread:$0]  %s559_s1, 128, %s23_s22, [#allocation4]  }
  0x13   :  { %s398_s13 = scalar_lea.hbm %s561_s3, 128 }
  0x14   :  { %p399_p8 = scmp.ne.s32.totalorder %s561_s3, %s398_s13  ;;  %p402_p9 = scmp.lt.u32.totalorder %s398_s13, %s561_s3 }
  0x16   :  { %p404_p10 = pnand %p402_p9, %p399_p8 }
  0x18   :  { %407 = shalt.err (!%p404_p10)
}
  0x19   :  { %s408_s18 = scalar_lea.vmem %s35_s24, 128  ;;  %p413_p12 = scmp.lt.s32.totalorder %s35_s24, %s35_s24 }
  0x1a   :  { %p409_p11 = scmp.ne.s32.totalorder %s35_s24, %s408_s18  ;;  %p414_p13 = scmp.lt.s32.totalorder %s408_s18, %s408_s18 }
  0x1c   :  { %p415_p0 = por %p414_p13, %p413_p12 }
  0x1e   :  { %p416_p1 = pnand %p415_p0, %p409_p11 }
  0x20   :  { %419 = shalt.err (!%p416_p1)
}
  0x21   :  { %37 = dma.hbm_to_vmem [thread:$0]  %s561_s3, 128, %s35_s24, [#allocation7]  }
  0x22   :  { %442 = dma.done.wait [#allocation4], 128  }
  0x23   :  { %443 = vsyncadd [#allocation4], 4294967168 }
  0x24   :  { %444 = dma.done.wait [#allocation7], 128  }
  0x25   :  { %445 = vsyncadd [#allocation7], 4294967168  ;;  %vm63_vm0 = vcmask 261120   ;;  %v78_v0 = vld [vmem:[%s560_s2] sm:$0xff]  ;;  %v70_v6 = vld [vmem:[#allocation6] sm:$0xff]  ;;  %v450_v15 = vmov 0.0  }
  0x26   :  { %v61_v1 = vld [vmem:[%s558_s0] sm:$0xff]  ;;  %v79_v3 = vmul.f32 %v78_v0, %v78_v0  ;;  %v264_v7 = vld [vmem:[#allocation3] sm:$0xff]  ;;  %v71_v8 = vmul.f32 %v70_v6, %v70_v6  ;;  %341 = vmatprep.subr.mxu0 %v450_v15  ;;  %346 = vmatprep.subr.mxu1 %v450_v15  ;;  %vm451_vm1 = vmmov 0   ;;  %vm59_vm2 = vcmask 7168  }
  0x27   :  { %v86_v2 = vld [vmem:[%s562_s4] sm:$0xff]  ;;  %v62_v4 = vmul.f32 %v61_v1, %v61_v1  ;;  %v265_v12 = vmul.f32 %v264_v7, %v264_v7  ;;  %343 = vmatprep.mubr.msk.f32.mxu0 %vm451_vm1, %v450_v15  ;;  %348 = vmatprep.mubr.msk.f32.mxu1 %vm451_vm1, %v450_v15  ;;  %60 = vst.msk [vmem:[#allocation2] sm:$0xff] %vm59_vm2, %v450_v15  ;;  %vm254_vm3 = vcmask 64512   ;;  %vm54_vm4 = vcmask 8192  }
  0x28   :  { %v87_v5 = vmul.f32 %v86_v2, %v86_v2  ;;  %v80_v9 = vsel %vm63_vm0, %v79_v3, 0.0  ;;  %v72_v13 = vsel %vm63_vm0, %v71_v8, 0.0  ;;  %v281_v50 = vld [vmem:[%s563_s5] sm:$0xff]  ;;  %55 = vst.msk [vmem:[#allocation8] sm:$0x1] %vm54_vm4, %v450_v15  ;;  %s452_s5 = smov [#allocation8]  }
  0x29   :  { %81 = vadd.xlane.f32.xlu0 %v80_v9  ;;  %v64_v11 = vsel %vm63_vm0, %v62_v4, 0.0  ;;  %v266_v14 = vsel %vm63_vm0, %v265_v12, 0.0  ;;  %v282_v51 = vsub.f32 1.0, %v281_v50  ;;  %s323_s24 = sshll.u32 %s452_s5, 4  ;;  %s324_s24 = int_to_ptr.vmem [resolvable:$true] %s323_s24 }
  0x2a   :  { %v88_v10 = vsel %vm63_vm0, %v87_v5, 0.0  ;;  %s420_s27 = scalar_lea.vmem %s324_s24, 16  ;;  %s424_s28 = scalar_lea.vmem %s324_s24, 32 }
  0x2b   :  { %89 = vadd.xlane.f32.xlu1 %v88_v10  ;;  %v297_v52 = vsel %vm59_vm2, %v282_v51, 0.0  ;;  %p421_p2 = scmp.ne.s32.totalorder %s324_s24, %s420_s27  ;;  %p425_p3 = scmp.lt.s32.totalorder %s324_s24, %s324_s24 }
  0x2c   :  { %p426_p4 = scmp.lt.s32.totalorder %s424_s28, %s420_s27 }
  0x2d   :  { %65 = vadd.xlane.f32.xlu0 %v64_v11 }
  0x2e   :  { %v252_v56 = vld [vmem:[#allocation2] sm:$0xff]  ;;  %p427_p5 = por %p426_p4, %p425_p3 }
  0x2f   :  { %73 = vadd.xlane.f32.xlu1 %v72_v13 }
  0x30   :  { %p428_p6 = pnand %p427_p5, %p421_p2 }
  0x31   :  { %267 = vadd.xlane.f32.xlu0 %v266_v14 }
  0xb6   :  { %v82_v16 = vpop.xlane.xlu0 %81 }
  0xb7   :  { %v83_v18 = vmax.f32 %v82_v16, 1e-24 }
  0xb8   :  { %v90_v17 = vpop.xlane.xlu1 %89 }
  0xb9   :  { %v91_v19 = vmax.f32 %v90_v17, 1e-24  ;;  %360 = vrsqrt.f32 %v83_v18  ;;  %v307_v18 = vlaneseq }
  0xba   :  { %v66_v20 = vpop.xlane.xlu0 %65 }
  0xbb   :  { %362 = vrsqrt.f32 %v91_v19  ;;  %v67_v22 = vmax.f32 %v66_v20, 1e-24  ;;  %v308_v19 = vand.u32 127, %v307_v18  ;;  %v309_v20 = vld [vmem:[#allocation8] sm:$0x1] }
  0xbc   :  { %v74_v21 = vpop.xlane.xlu1 %73 }
  0xbd   :  { %v75_v23 = vmax.f32 %v74_v21, 1e-24  ;;  %364 = vrsqrt.f32 %v67_v22  ;;  %vm310_vm5 = vcmp.eq.s32.totalorder %v308_v19, 0 }
  0xbe   :  { %v268_v24 = vpop.xlane.xlu0 %267 }
  0xbf   :  { %366 = vrsqrt.f32 %v75_v23  ;;  %v269_v25 = vmax.f32 %v268_v24, 1e-24 }
  0xc1   :  { %368 = vrsqrt.f32 %v269_v25 }
  0xc3   :  { %v361_v26 = vpop.eup %360 }
  0xc4   :  { %v85_v28 = vmul.f32 %v361_v26, %v78_v0 }
  0xc5   :  { %v363_v27 = vpop.eup %362 }
  0xc6   :  { %v93_v29 = vmul.f32 %v363_v27, %v86_v2  ;;  %342 = vmatpush3.xpose.msk.msra.mxu0 %vm63_vm0, %v85_v28 }
  0xc7   :  { %v365_v30 = vpop.eup %364 }
  0xc8   :  { %347 = vmatpush3.xpose.msk.msra.mxu1 %vm63_vm0, %v93_v29  ;;  %v69_v32 = vmul.f32 %v365_v30, %v61_v1 }
  0xc9   :  { %v367_v31 = vpop.eup %366 }
  0xca   :  { %v77_v33 = vmul.f32 %v367_v31, %v70_v6  ;;  %344 = vmatmul.mubr.msk.f32.vlgmr.msra.gmra.mrb[0].mxu0 %vm63_vm0, %v69_v32 }
  0xcb   :  { %v369_v34 = vpop.eup %368 }
  0xcc   :  { %349 = vmatmul.mubr.msk.f32.vlgmr.msra.gmra.mrb[0].mxu1 %vm63_vm0, %v77_v33  ;;  %v271_v35 = vmul.f32 %v369_v34, %v264_v7 }
  0xce   :  { %v272_v36 = vmul.f32 %v271_v35, %v69_v32 }
  0xd0   :  { %v273_v37 = vsel %vm63_vm0, %v272_v36, 0.0 }
  0xd1   :  { %274 = vadd.xlane.f32.xlu1 %v273_v37 }
 0x15e   :  { %v275_v53 = vpop.xlane.xlu1 %274 }
 0x15f   :  { %v276_v54 = vmul.f32 2.0, %v275_v53 }
 0x161   :  { %v277_v55 = vmul.f32 1.442695, %v276_v54 }
 0x19d   :  { %v166_v38 = vpop.f32.mrb[0].mxu0 }
 0x19e   :  { %v170_v39 = vmul.f32 2.0, %v166_v38  ;;  %v345_v40 = vpop.f32.mrb[1].mxu0 }
 0x19f   :  { %v245_v41 = vpop.f32.mrb[0].mxu1 }
 0x1a0   :  { %v350_v42 = vpop.f32.mrb[1].mxu1  ;;  %v171_v43 = vmul.f32 1.442695, %v170_v39  ;;  %v249_v44 = vsub.f32 0.6, %v245_v41 }
 0x1a2   :  { %370 = vpow2.f32 %v171_v43  ;;  %v250_v45 = vmax.f32 %v249_v44, 0.0 }
 0x1a3   :  { %372 = vpow2.f32 %v277_v55 }
 0x1a4   :  { %v251_v46 = vmul.f32 0.5, %v250_v45 }
 0x1ac   :  { %v371_v47 = vpop.eup %370 }
 0x1ad   :  { %v253_v48 = vmul.f32 %v371_v47, %v251_v46  ;;  %v373_v59 = vpop.eup %372 }
 0x1af   :  { %v255_v49 = vsel %vm254_vm3, %v253_v48, 0.0 }
 0x1b0   :  { %256 = vadd.xlane.f32.xlu0 %v255_v49 }
 0x1b4   :  { %298 = vadd.xlane.f32.xlu0 %v297_v52 }
 0x23d   :  { %v257_v57 = vpop.xlane.xlu0 %256 }
 0x23e   :  { %v258_v58 = vadd.f32 %v257_v57, %v252_v56 }
 0x240   :  { %260 = vst.msk [vmem:[#allocation2] sm:$0xff] %vm59_vm2, %v258_v58 }
 0x241   :  { %v299_v3 = vpop.xlane.xlu0 %298 }
 0x242   :  { %v300_v4 = vrot.slane %v299_v3, 4 }
 0x244   :  { %v301_v5 = vadd.f32 %v300_v4, %v299_v3 }
 0x246   :  { %v302_v6 = vrot.slane %v301_v5, 2 }
 0x247   :  { %v279_v60 = vld [vmem:[#allocation2] sm:$0xff] }
 0x248   :  { %v280_v61 = vadd.f32 %v373_v59, %v279_v60  ;;  %v303_v10 = vadd.f32 %v302_v6, %v301_v5 }
 0x24a   :  { %374 = vlog2.f32 %v280_v61  ;;  %v304_v13 = vrot.slane %v303_v10, 1 }
 0x24c   :  { %v305_v17 = vadd.f32 %v304_v13, %v303_v10 }
 0x254   :  { %v375_v62 = vpop.eup %374 }
 0x255   :  { %v284_v63 = vmul.f32 0.6931472, %v375_v62 }
 0x257   :  { %v285_v0 = vsub.f32 %v276_v54, %v284_v63 }
 0x259   :  { %v286_v1 = vmul.f32 %v285_v0, %v282_v51 }
 0x25b   :  { %v287_v2 = vsel %vm59_vm2, %v286_v1, 0.0 }
 0x25c   :  { %288 = vadd.xlane.f32.xlu1 %v287_v2 }
 0x2e9   :  { %v289_v7 = vpop.xlane.xlu1 %288 }
 0x2ea   :  { %v290_v8 = vrot.slane %v289_v7, 4 }
 0x2ec   :  { %v291_v9 = vadd.f32 %v290_v8, %v289_v7 }
 0x2ee   :  { %v292_v11 = vrot.slane %v291_v9, 2 }
 0x2f0   :  { %v293_v12 = vadd.f32 %v292_v11, %v291_v9 }
 0x2f2   :  { %v294_v14 = vrot.slane %v293_v12, 1 }
 0x2f4   :  { %v295_v16 = vadd.f32 %v294_v14, %v293_v12 }
 0x2f6   :  { %351 = vpush %v295_v16 }
 0x2f7   :  { %353 = vpush %v305_v17 }
 0x327   :  { %s352_s3 = spop %351 }
 0x328   :  { %v311_v15 = vstv %s352_s3  ;;  %s354_s4 = spop %353 }
 0x329   :  { %v312_v21 = vstv %s354_s4 }
 0x32a   :  { %v313_v22 = vsel %vm310_vm5, %v311_v15, %v312_v21 }
 0x32b   :  { %v314_v23 = vadd.f32 %v313_v22, %v309_v20 }
 0x32d   :  { %316 = vst.msk [vmem:[#allocation8] sm:$0x1] %vm54_vm4, %v314_v23 }
 0x32e   :  { %431 = shalt.err (!%p428_p6)
}
 0x32f   :  { %s432_s7 = scalar_lea.hbm %s564_s6, 16 }
 0x330   :  { %p433_p7 = scmp.ne.s32.totalorder %s564_s6, %s432_s7  ;;  %p436_p8 = scmp.lt.u32.totalorder %s432_s7, %s564_s6 }
 0x332   :  { %p438_p9 = pnand %p436_p8, %p433_p7 }
 0x334   :  { %441 = shalt.err (!%p438_p9)
}
 0x335   :  { %326 = dma.vmem_to_hbm [thread:$0]  %s324_s24, 16, %s564_s6, [#allocation5]  }
 0x336   :  { %446 = dma.done.wait [#allocation5], 16  }
 0x337   :  { %447 = vsyncadd [#allocation5], 4294967280 }
 0x338   :  { %330 = vsyncpa [#allocation4], 1 }
 0x339   :  { %331 = vsyncpa [#allocation7], 1 }
 0x33a   :  { %332 = vsyncpa [#allocation5], 1 }

</bundles_post_ra>
